<compile_context>
chip_gen: v7x
topology: tpu7x:2x2x1
jax: 0.10.0
libtpu: 0.0.40
codegen_flags: <defaults>
</compile_context>

<pallas_src>
import functools

import jax
import jax.numpy as jnp
from jax.experimental import pallas as pl
from jax.experimental.pallas import tpu as pltpu


def _round_up(x, m):
    return (x + m - 1) // m * m


@functools.lru_cache(maxsize=None)
def _vmem_budget():
    """Returns (per-input tile byte budget, scoped-VMEM limit) per TPU generation."""
    vmem_cap = 128 * 1024 * 1024
    try:
        info = pltpu.get_tpu_info()
        vmem_cap = int(getattr(info, "vmem_capacity_bytes", vmem_cap))
    except Exception:
        pass
    if vmem_cap <= 64 * 1024 * 1024:
        # v7x-class: 64 MiB VMEM per TensorCore.
        return 8 * 1024 * 1024, 40 * 1024 * 1024
    # v5e / v6e: 128 MiB physical VMEM -> bigger tiles amortize per-step overhead.
    return 12 * 1024 * 1024, 56 * 1024 * 1024


def _gap_rows_kernel(x_ref, o_ref, *, inv_hw):
    # x_ref: (TM, HW) -> o_ref: (1, 1, TM)  (lane-dense output slab)
    s = jnp.sum(x_ref[...], axis=-1, dtype=jnp.float32)        # f32 accumulation
    o_ref[0, 0, :] = (s * inv_hw).astype(o_ref.dtype)


def _gap_rows_chunked_kernel(x_ref, o_ref, acc_ref, *, inv_hw, hw_true, hw_chunk,
                             mask_tail):
    # x_ref: (TM, HW_CHUNK); o_ref: (1, 1, TM); acc_ref: (TM, 128) f32 scratch.
    j = pl.program_id(1)

    @pl.when(j == 0)
    def _init():
        acc_ref[...] = jnp.zeros_like(acc_ref)

    x = x_ref[...]
    if mask_tail:
        # HW % hw_chunk != 0: zero the stale lanes of the clipped final chunk so
        # they never corrupt valid row sums (garbage *rows* beyond R only land
        # in discarded output rows, so they need no masking).
        valid = hw_true - j * hw_chunk
        col = jax.lax.broadcasted_iota(jnp.int32, x.shape, dimension=1)
        x = jnp.where(col < valid, x, jnp.zeros_like(x))

    # Steady state: fold lane groups into a (TM, 128) f32 accumulator (VPU adds
    # only); the cross-lane (XLU) reduce is deferred to the finalize step.
    xr = x.reshape(x.shape[0], hw_chunk // 128, 128)
    acc_ref[...] += jnp.sum(xr, axis=1, dtype=jnp.float32)

    @pl.when(j == pl.num_programs(1) - 1)
    def _finalize():
        s = jnp.sum(acc_ref[...], axis=-1)      # single cross-lane reduce per row tile
        # NOTE: divide by the TRUE spatial size, never the chunk size.
        o_ref[0, 0, :] = (s * inv_hw).astype(o_ref.dtype)


def _global_avg_pool_rows(x2, hw_true, tile_budget_override=None):
    """x2: (R, HW) -> (R,) row means, dividing by hw_true."""
    R, HW = x2.shape
    dtype = x2.dtype
    itemsize = dtype.itemsize
    sub = 8 * max(1, 4 // itemsize)          # sublane packing: f32->8, bf16->16, i8->32
    inv_hw = 1.0 / float(hw_true)

    tile_budget, vmem_limit = _vmem_budget()
    if tile_budget_override is not None:
        tile_budget = tile_budget_override

    # Per-row VMEM footprint (last dim pads to a 128-lane multiple in VMEM).
    row_bytes_vmem = _round_up(HW, 128) * itemsize

    cost = pl.CostEstimate(flops=R * HW, transcendentals=0,
                           bytes_accessed=R * HW * itemsize + R * itemsize)

    if sub * row_bytes_vmem <= tile_budget:
        # Common path: whole spatial extent per block; tile the (B*C) rows.
        # tm is capped only by the VMEM budget and round_up(R, sub); no padding —
        # the clipped last block's garbage rows land in output rows >= R.
        tm = (tile_budget // row_bytes_vmem) // sub * sub
        tm = max(sub, tm)
        tm = min(tm, _round_up(R, sub))
        g = pl.cdiv(R, tm)

        out = pl.pallas_call(
            functools.partial(_gap_rows_kernel, inv_hw=inv_hw),
            out_shape=jax.ShapeDtypeStruct((g, 1, tm), dtype),
            grid_spec=pltpu.PrefetchScalarGridSpec(
                num_scalar_prefetch=0,
                grid=(g,),
                in_specs=[pl.BlockSpec((tm, HW), lambda i: (i, 0))],
                out_specs=pl.BlockSpec((1, 1, tm), lambda i: (i, 0, 0)),
            ),
            compiler_params=pltpu.CompilerParams(
                dimension_semantics=("parallel",),
                vmem_limit_bytes=vmem_limit,
            ),
            cost_estimate=cost,
        )(x2)
    else:
        # Huge spatial extent: chunk the reduction axis ("arbitrary") and
        # accumulate partial sums in a (TM, 128) f32 VMEM scratch.  TM=128 keeps
        # the output store lane-dense and each input DMA covers 128 contiguous
        # rows.  The ragged HW tail is masked in-kernel (no jnp.pad of the
        # full tensor).
        tm = min(128, _round_up(R, sub))
        hw_chunk = max(128, (tile_budget // (tm * max(itemsize, 4))) // 128 * 128)
        g = pl.cdiv(R, tm)
        n_hw = pl.cdiv(HW, hw_chunk)
        mask_tail = (HW % hw_chunk) != 0

        out = pl.pallas_call(
            functools.partial(_gap_rows_chunked_kernel, inv_hw=inv_hw,
                              hw_true=hw_true, hw_chunk=hw_chunk,
                              mask_tail=mask_tail),
            out_shape=jax.ShapeDtypeStruct((g, 1, tm), dtype),
            grid_spec=pltpu.PrefetchScalarGridSpec(
                num_scalar_prefetch=0,
                grid=(g, n_hw),
                in_specs=[pl.BlockSpec((tm, hw_chunk), lambda i, j: (i, j))],
                out_specs=pl.BlockSpec((1, 1, tm), lambda i, j: (i, 0, 0)),
                scratch_shapes=[pltpu.VMEM((tm, 128), jnp.float32)],
            ),
            compiler_params=pltpu.CompilerParams(
                dimension_semantics=("parallel", "arbitrary"),
                vmem_limit_bytes=vmem_limit,
            ),
            cost_estimate=cost,
        )(x2)

    return out.reshape(-1)[:R]


def fast_global_avg_pool2d(x, flatten=False):
    """x: (B, C, H, W). Returns (B, C) if flatten else (B, C, 1, 1)."""
    B, C, H, W = x.shape
    R, HW = B * C, H * W
    out_flat = _global_avg_pool_rows(x.reshape(R, HW), hw_true=HW)  # (R,)
    if flatten:
        return out_flat.reshape(B, C)
    return out_flat.reshape(B, C, 1, 1)


if __name__ == "__main__":
    key = jax.random.PRNGKey(0)
    x = jax.random.normal(key, (2, 4, 16, 16), dtype=jnp.float32)

    # non-flatten variant: (B, C, 1, 1)
    y = fast_global_avg_pool2d(x, flatten=False)
    # flatten variant: (B, C)
    y_flat = fast_global_avg_pool2d(x, flatten=True)
    jax.block_until_ready((y, y_flat))

    ref = jnp.mean(x.reshape(2, 4, -1), axis=-1)
    assert y.shape == (2, 4, 1, 1)
    assert y_flat.shape == (2, 4)
    assert jnp.allclose(y_flat, ref, atol=1e-5, rtol=1e-5)
    assert jnp.allclose(y.reshape(2, 4), ref, atol=1e-5, rtol=1e-5)

    # Row count not a multiple of the sublane tile: exercises the unpadded,
    # clipped last row-block (garbage rows are sliced off in the wrapper).
    x2 = jax.random.normal(jax.random.PRNGKey(1), (2, 5, 16, 16), dtype=jnp.float32)
    y2 = fast_global_avg_pool2d(x2, flatten=True)
    jax.block_until_ready(y2)
    ref2 = jnp.mean(x2.reshape(2, 5, -1), axis=-1)
    assert y2.shape == (2, 5)
    assert jnp.allclose(y2, ref2, atol=1e-5, rtol=1e-5)

    # Force the chunked (huge-HW) path with a tiny tile budget to exercise the
    # 2-D accumulator and the in-kernel masking of the ragged tail chunk.
    x3 = jax.random.normal(jax.random.PRNGKey(2), (8, 384), dtype=jnp.float32)
    y3 = _global_avg_pool_rows(x3, hw_true=384, tile_budget_override=8 * 1024)
    jax.block_until_ready(y3)
    ref3 = jnp.mean(x3, axis=-1)
    assert jnp.allclose(y3, ref3, atol=1e-5, rtol=1e-5)

    print("KERNEL_OK")
</pallas_src>

<mosaic_0001>
module attributes {stable_mosaic.version = 11 : i64} {
  func.func @_gap_rows_kernel(%arg0: i32, %arg1: memref<8x256xf32, #tpu.memory_space<vmem>>, %arg2: memref<1x1x8xf32, #tpu.memory_space<vmem>>) attributes {dimension_semantics = [#tpu.dimension_semantics<parallel>], iteration_bounds = array<i64: 1>, scalar_prefetch = 0 : i64, scratch_operands = 0 : i64, tpu.core_type = #tpu.core_type<tc>, window_params = [{transform_indices = @transform_0, window_bounds = array<i64: 8, 256>}, {transform_indices = @transform_1, window_bounds = array<i64: 1, 1, 8>}]} {
    %c0 = arith.constant 0 : index
    %c0_0 = arith.constant 0 : index
    %0 = vector.load %arg1[%c0, %c0_0] : memref<8x256xf32, #tpu.memory_space<vmem>>, vector<8x256xf32>
    %cst = arith.constant dense<0.000000e+00> : vector<8xf32>
    %1 = vector.multi_reduction <add>, %0, %cst [1] : vector<8x256xf32> to vector<8xf32>
    %cst_1 = arith.constant 3.906250e-03 : f32
    %2 = vector.broadcast %cst_1 : f32 to vector<8xf32>
    %3 = arith.mulf %1, %2 : vector<8xf32>
    %c0_2 = arith.constant 0 : index
    %c0_3 = arith.constant 0 : index
    %c0_4 = arith.constant 0 : index
    %4 = vector.load %arg2[%c0_2, %c0_3, %c0_4] : memref<1x1x8xf32, #tpu.memory_space<vmem>>, vector<1x1x8xf32>
    %5 = vector.shape_cast %4 : vector<1x1x8xf32> to vector<8xf32>
    %6 = vector.shape_cast %3 : vector<8xf32> to vector<1x1x8xf32>
    tpu.vector_store %arg2[%c0_2, %c0_3, %c0_4], %6 {strides = array<i32>} : memref<1x1x8xf32, #tpu.memory_space<vmem>>, vector<1x1x8xf32>,
    return
  }
  func.func @transform_0(%arg0: i32) -> (i32, i32) {
    %c0_i32 = arith.constant 0 : i32
    %c0_i32_0 = arith.constant 0 : i32
    return %arg0, %c0_i32 : i32, i32
  }
  func.func @transform_1(%arg0: i32) -> (i32, i32, i32) {
    %c0_i32 = arith.constant 0 : i32
    %c0_i32_0 = arith.constant 0 : i32
    %c0_i32_1 = arith.constant 0 : i32
    return %arg0, %c0_i32, %c0_i32_0 : i32, i32, i32
  }
}

</mosaic_0001>

<bundles_post_ra>
// kernel: tpu_custom_call.1
= control target key start
LH: loop header
LB: loop body
LE: loop exit
PB: predicated region body
PF: predicated region fallthrough
CT: control target
= control target key end

     0   :  { %6 = vsyncpa [#allocation3], 0  ;;  %s138_s0 = inlined_call_operand.hbm [shape: f32[8,256], index: 0, kind: input, shape index: {}]   ;;  %s139_s1 = inlined_call_operand.hbm [shape: f32[1,1,8], index: 1, kind: output, shape index: {}]  }
   0x1   :  { %7 = vsyncpa [#allocation4], 0  ;;  %s102_s6 = smov [#allocation2]   ;;  %s54_s10 = scalar_lea.hbm %s138_s0, 256 }
   0x2   :  { %s14_s7 = sshll.u32 %s102_s6, 4  ;;  %p55_p0 = scmp.ne.s32.totalorder %s138_s0, %s54_s10  ;;  %s15_s7 = int_to_ptr.vmem [resolvable:$true] %s14_s7 }
   0x3   :  { %p58_p1 = scmp.lt.u32.totalorder %s54_s10, %s138_s0 }
   0x5   :  { %p60_p2 = pnand %p58_p1, %p55_p0 }
   0x7   :  { %63 = shalt.err (!%p60_p2)
}
   0x8   :  { %s64_s15 = scalar_lea.vmem %s15_s7, 256  ;;  %p69_p4 = scmp.lt.s32.totalorder %s15_s7, %s15_s7 }
   0x9   :  { %p65_p3 = scmp.ne.s32.totalorder %s15_s7, %s64_s15  ;;  %p70_p5 = scmp.lt.s32.totalorder %s64_s15, %s64_s15 }
   0xb   :  { %p71_p6 = por %p70_p5, %p69_p4 }
   0xd   :  { %p72_p7 = pnand %p71_p6, %p65_p3 }
   0xf   :  { %75 = shalt.err (!%p72_p7)
}
  0x10   :  { %17 = dma.hbm_to_vmem [thread:$0]  %s138_s0, 256, %s15_s7, [#allocation3]  }
  0x11   :  { %98 = dma.done.wait [#allocation3], 256  }
  0x12   :  { %99 = vsyncadd [#allocation3], 4294967040  ;;  %v21_v0 = vld [vmem:[#allocation2] sm:$0xff]  ;;  %v22_v1 = vld [vmem:[#allocation2 + $0x8] sm:$0xff]  ;;  %v28_v3 = vlaneseq  ;;  %s103_s18 = smov [#allocation5]   ;;  %vm35_vm0 = vcmask 57344  }
  0x13   :  { %v23_v2 = vadd.f32 %v22_v1, %v21_v0  ;;  %s43_s19 = sshll.u32 %s103_s18, 4  ;;  %s44_s19 = int_to_ptr.vmem [resolvable:$true] %s43_s19 }
  0x14   :  { %v29_v4 = vand.u32 127, %v28_v3  ;;  %v31_v5 = vshrl.u32 %v28_v3, 7  ;;  %s76_s20 = scalar_lea.vmem %s44_s19, 16  ;;  %s80_s0 = scalar_lea.vmem %s44_s19, 32 }
  0x15   :  { %24 = vadd.xlane.f32.xlu0 %v23_v2  ;;  %p77_p8 = scmp.ne.s32.totalorder %s44_s19, %s76_s20  ;;  %p81_p9 = scmp.lt.s32.totalorder %s44_s19, %s44_s19 }
  0x16   :  { %v32_v6 = vsub.s32 %v29_v4, %v31_v5  ;;  %p82_p10 = scmp.lt.s32.totalorder %s80_s0, %s76_s20 }
  0x18   :  { %p83_p11 = por %p82_p10, %p81_p9 }
  0x1a   :  { %p84_p12 = pnand %p83_p11, %p77_p8 }
  0xa2   :  { %v25_v7 = vpop.xlane.xlu0 %24 }
  0xa3   :  { %v26_v8 = vmul.f32 0.00390625, %v25_v7 }
  0xa5   :  { %v33_v9 = vrot.slane %v26_v8, %v32_v6 }
  0xa7   :  { %36 = vst.msk [vmem:[#allocation5] sm:$0x1] %vm35_vm0, %v33_v9 }
  0xa8   :  { %87 = shalt.err (!%p84_p12)
}
  0xa9   :  { %s88_s23 = scalar_lea.hbm %s139_s1, 16 }
  0xaa   :  { %p89_p13 = scmp.ne.s32.totalorder %s139_s1, %s88_s23  ;;  %p92_p0 = scmp.lt.u32.totalorder %s88_s23, %s139_s1 }
  0xac   :  { %p94_p1 = pnand %p92_p0, %p89_p13 }
  0xae   :  { %97 = shalt.err (!%p94_p1)
}
  0xaf   :  { %46 = dma.vmem_to_hbm [thread:$0]  %s44_s19, 16, %s139_s1, [#allocation4]  }
  0xb0   :  { %100 = dma.done.wait [#allocation4], 16  }
  0xb1   :  { %101 = vsyncadd [#allocation4], 4294967280 }
  0xb2   :  { %50 = vsyncpa [#allocation3], 1 }
  0xb3   :  { %51 = vsyncpa [#allocation4], 1 }

</bundles_post_ra>
